<compile_context>
chip_gen: v7x
topology: tpu7x:2x2x1
jax: 0.10.0
libtpu: 0.0.40
codegen_flags: <defaults>
</compile_context>

<pallas_src>
import functools

import jax
import jax.numpy as jnp
from jax.experimental import pallas as pl
from jax.experimental.pallas import tpu as pltpu


def _round_up(x: int, m: int) -> int:
    return ((x + m - 1) // m) * m


def _fold_rows_to_8(x):
    """Fold an (rows, L) f32 array to (8, L) column-partial sums.

    rows is a static multiple of 8. Uses a log-depth tree of full-width vreg
    adds only (static sublane-aligned slices), no XLU reduces, no masked ops.
    """
    rows = x.shape[0]
    if rows <= 8:
        return x
    half8 = (rows // 16) * 8                      # multiple of 8, >= 8
    folded = _fold_rows_to_8(x[:half8] + x[half8:2 * half8])
    if rows - 2 * half8:                          # remainder is exactly 8 rows
        folded = folded + x[2 * half8:]
    return folded


def _phosc_loss_kernel(*refs, batch, phos_len, phoc_len, tile_b,
                       steps_per_split, need_mask, pre_split, binary_targets):
    if pre_split:
        (phos_ref, phoc_ref, phos_t_ref, phoc_t_ref,
         out_ref, acc_mse_ref, acc_bce_ref) = refs
    else:
        (phos_ref, phoc_ref, tgt_ref,
         out_ref, acc_mse_ref, acc_bce_ref) = refs

    s = pl.program_id(0)      # core-split axis ("parallel"; 2 TCs on v7x)
    i = pl.program_id(1)      # reduction axis ("arbitrary")

    @pl.when(i == 0)
    def _init():
        acc_mse_ref[...] = jnp.zeros_like(acc_mse_ref)
        acc_bce_ref[...] = jnp.zeros_like(acc_bce_ref)

    # Upcast in-kernel; inputs may arrive bf16 — all reductions stay f32.
    phos_p = phos_ref[...].astype(jnp.float32)            # (tile_b, phos_len)
    phoc_p = phoc_ref[...].astype(jnp.float32)            # (tile_b, phoc_len)

    if pre_split:
        phos_t = phos_t_ref[...].astype(jnp.float32)
        phoc_t = phoc_t_ref[...].astype(jnp.float32)
    else:
        # Fallback: in-kernel split of the concatenated slab. The static slice
        # at lane offset `phos_len` (non-128-aligned) costs a per-step
        # relayout; prefer passing targets pre-split (review option (a)).
        tgt = tgt_ref[...].astype(jnp.float32)
        phos_t = tgt[:, :phos_len]
        phoc_t = tgt[:, phos_len:phos_len + phoc_len]

    # ---- elementwise squared error ----
    diff = phos_p - phos_t
    mse_e = diff * diff                                   # (tile_b, phos_len)

    # ---- elementwise BCE (PyTorch clamps each log at -100) ----
    if binary_targets:
        # Hard 0/1 targets: single log halves EUP work (gated — not valid for
        # soft targets).
        sel = jnp.where(phoc_t >= 0.5, phoc_p, 1.0 - phoc_p)
        bce_e = -jnp.maximum(jnp.log(sel), -100.0)
    else:
        log_p = jnp.maximum(jnp.log(phoc_p), -100.0)
        log_1mp = jnp.maximum(jnp.log(1.0 - phoc_p), -100.0)
        bce_e = -(phoc_t * log_p + (1.0 - phoc_t) * log_1mp)

    def _accumulate(m, b):
        # Lane-dense accumulation: fold rows -> 8 with full-width VPU adds and
        # do a single (8, L) add+store per step. Cross-lane reduce is deferred
        # to the finalize branch.
        acc_mse_ref[...] += _fold_rows_to_8(m)
        acc_bce_ref[...] += _fold_rows_to_8(b)

    if need_mask:
        g = s * steps_per_split + i                       # unclamped tile index
        may_pad = (g + 1) * tile_b > batch                # scalar

        @pl.when(may_pad)
        def _masked():
            row = g * tile_b + jax.lax.broadcasted_iota(jnp.int32, (tile_b, 1), 0)
            valid = row < batch                           # drop padded / duplicated rows
            _accumulate(jnp.where(valid, mse_e, 0.0),
                        jnp.where(valid, bce_e, 0.0))

        @pl.when(jnp.logical_not(may_pad))
        def _full():
            _accumulate(mse_e, bce_e)
    else:
        _accumulate(mse_e, bce_e)

    @pl.when(i == pl.num_programs(1) - 1)
    def _finalize():
        out_ref[0, 0] = jnp.sum(acc_mse_ref[...])
        out_ref[0, 1] = jnp.sum(acc_bce_ref[...])


def phosc_loss(y: dict, targets, phos_w: float = 4.5, phoc_w: float = 1.0, *,
               batch_tile: int = 1024, num_core_splits=None,
               binary_targets: bool = False):
    """PHOSC loss.

    `targets` may be a single (B, phos_len + phoc_len) array (module contract)
    or a tuple (phos_target, phoc_target) — the latter is preferred (no
    in-kernel split relayout; the DMA does the split for free).
    """
    phos_out = y["phos"]
    phoc_out = y["phoc"]
    B, L1 = phos_out.shape
    _, L2 = phoc_out.shape

    if isinstance(targets, (tuple, list)):
        phos_t, phoc_t = targets
        assert phos_t.shape == (B, L1) and phoc_t.shape == (B, L2)
        tgt_arrays = [phos_t, phoc_t]
        pre_split = True
    else:
        assert targets.shape == (B, L1 + L2), targets.shape
        tgt_arrays = [targets]
        pre_split = False

    # ---- batch tile: multiple of 8, double-buffered working set <= 40 MiB ----
    tb = min(int(batch_tile), _round_up(B, 8))
    tb = max(8, (tb // 8) * 8)

    def _working_set(t):
        per_row = (_round_up(L1, 128) * phos_out.dtype.itemsize
                   + _round_up(L2, 128) * phoc_out.dtype.itemsize
                   + sum(_round_up(a.shape[1], 128) * a.dtype.itemsize
                         for a in tgt_arrays))
        return 2 * t * per_row                      # 2x double-buffered inputs

    WORK_BUDGET = 40 * 1024 * 1024                  # leaves headroom on v7x (64 MiB VMEM)
    while tb > 8 and _working_set(tb) > WORK_BUDGET:
        tb = max(8, (tb // 2) // 8 * 8)

    num_tiles = pl.cdiv(B, tb)

    # Two-way core split (v7x megacore); harmless serialization on v5e/v6e.
    if num_core_splits is None:
        num_core_splits = 2 if num_tiles >= 2 else 1
    n_split = max(1, min(int(num_core_splits), num_tiles))
    steps = pl.cdiv(num_tiles, n_split)
    # Masking needed iff some (split, step) row range extends past B
    # (partial last tile and/or duplicated clamped tiles).
    need_mask = (n_split * steps * tb != B)

    if n_split * steps == num_tiles:
        def in_map(s, i):
            return (s * steps + i, 0)
    else:
        def in_map(s, i):  # clamp duplicated trailing steps; their rows are masked out
            return (jnp.minimum(s * steps + i, num_tiles - 1), 0)

    in_specs = [pl.BlockSpec((tb, L1), in_map),
                pl.BlockSpec((tb, L2), in_map)]
    if pre_split:
        in_specs += [pl.BlockSpec((tb, L1), in_map),
                     pl.BlockSpec((tb, L2), in_map)]
    else:
        in_specs += [pl.BlockSpec((tb, L1 + L2), in_map)]

    scratch_bytes = 4 * 8 * (_round_up(L1, 128) + _round_up(L2, 128))
    vmem_limit = int(min(64 << 20,
                         max(32 << 20, _working_set(tb) + scratch_bytes + (2 << 20))))

    kernel = functools.partial(
        _phosc_loss_kernel,
        batch=B, phos_len=L1, phoc_len=L2, tile_b=tb, steps_per_split=steps,
        need_mask=need_mask, pre_split=pre_split,
        binary_targets=bool(binary_targets))

    bytes_accessed = int(phos_out.nbytes + phoc_out.nbytes
                         + sum(a.nbytes for a in tgt_arrays) + 8 * n_split)
    cost = pl.CostEstimate(
        flops=int(3 * B * L1 + 8 * B * L2),
        transcendentals=int((1 if binary_targets else 2) * B * L2),
        bytes_accessed=bytes_accessed)

    partials = pl.pallas_call(
        kernel,
        out_shape=jax.ShapeDtypeStruct((n_split, 2), jnp.float32),
        grid_spec=pltpu.PrefetchScalarGridSpec(
            num_scalar_prefetch=0,
            grid=(n_split, steps),
            in_specs=in_specs,
            out_specs=pl.BlockSpec((1, 2), lambda s, i: (s, 0),
                                   memory_space=pltpu.SMEM),
            scratch_shapes=[pltpu.VMEM((8, L1), jnp.float32),
                            pltpu.VMEM((8, L2), jnp.float32)],
        ),
        compiler_params=pltpu.CompilerParams(
            dimension_semantics=("parallel", "arbitrary"),
            vmem_limit_bytes=vmem_limit),
        cost_estimate=cost,
    )(phos_out, phoc_out, *tgt_arrays)

    # Combine per-split partial sums, divide and weight in plain JAX.
    mse = jnp.sum(partials[:, 0]) / (B * L1)
    bce = jnp.sum(partials[:, 1]) / (B * L2)
    return phos_w * mse + phoc_w * bce


# ----------------------------- reference & tests -----------------------------

def _reference_loss(y, targets, phos_w=4.5, phoc_w=1.0):
    phos_out = y["phos"].astype(jnp.float32)
    phoc_out = y["phoc"].astype(jnp.float32)
    L1 = phos_out.shape[1]
    L2 = phoc_out.shape[1]
    t = targets.astype(jnp.float32)
    phos_t, phoc_t = t[:, :L1], t[:, L1:L1 + L2]
    mse = jnp.mean((phos_out - phos_t) ** 2)
    log_p = jnp.maximum(jnp.log(phoc_out), -100.0)
    log_1mp = jnp.maximum(jnp.log(1.0 - phoc_out), -100.0)
    bce = jnp.mean(-(phoc_t * log_p + (1.0 - phoc_t) * log_1mp))
    return phos_w * mse + phoc_w * bce


def _make_inputs(key, B, phos_len, phoc_len):
    k1, k2, k3, k4 = jax.random.split(key, 4)
    phos_out = jax.random.normal(k1, (B, phos_len), dtype=jnp.float32)
    phoc_out = jax.nn.sigmoid(jax.random.normal(k2, (B, phoc_len), dtype=jnp.float32))
    phos_tgt = jax.random.normal(k3, (B, phos_len), dtype=jnp.float32)
    phoc_tgt = jax.random.bernoulli(k4, 0.3, (B, phoc_len)).astype(jnp.float32)
    targets = jnp.concatenate([phos_tgt, phoc_tgt], axis=1)
    return {"phos": phos_out, "phoc": phoc_out}, targets


if __name__ == "__main__":
    key = jax.random.PRNGKey(0)
    k_a, k_b, k_c = jax.random.split(key, 3)
    PHOS_LEN, PHOC_LEN = 165, 604   # real (non-128-aligned) PHOSC head widths

    # 1) Tiny batch (B=6 < 8): sublane-padded tile + row masking, pre-split targets.
    y_a, tgt_a = _make_inputs(k_a, 6, PHOS_LEN, PHOC_LEN)
    pre_a = (tgt_a[:, :PHOS_LEN], tgt_a[:, PHOS_LEN:])
    loss_a = jax.block_until_ready(phosc_loss(y_a, pre_a))
    ref_a = _reference_loss(y_a, tgt_a)
    assert jnp.allclose(loss_a, ref_a, rtol=1e-5, atol=1e-5), (loss_a, ref_a)

    # 2) Multi-tile grid with a 2-way core split (B=20, tile 8 -> 3 tiles, one
    #    partial + one duplicated/masked step), concatenated-targets fallback.
    y_b, tgt_b = _make_inputs(k_b, 20, PHOS_LEN, PHOC_LEN)
    loss_b = jax.block_until_ready(phosc_loss(y_b, tgt_b, batch_tile=8))
    ref_b = _reference_loss(y_b, tgt_b)
    assert jnp.allclose(loss_b, ref_b, rtol=1e-5, atol=1e-5), (loss_b, ref_b)

    # 3) bf16 inputs (native model dtype), aligned batch (no masking path),
    #    pre-split targets and the gated single-log (binary targets) BCE.
    y_c, tgt_c = _make_inputs(k_c, 64, PHOS_LEN, PHOC_LEN)
    y_c = {k: v.astype(jnp.bfloat16) for k, v in y_c.items()}
    tgt_c = tgt_c.astype(jnp.bfloat16)
    pre_c = (tgt_c[:, :PHOS_LEN], tgt_c[:, PHOS_LEN:])
    loss_c = jax.block_until_ready(
        phosc_loss(y_c, pre_c, batch_tile=16, binary_targets=True))
    ref_c = _reference_loss(y_c, tgt_c)
    assert jnp.allclose(loss_c, ref_c, rtol=1e-3, atol=1e-3), (loss_c, ref_c)

    print("KERNEL_OK")
</pallas_src>

<mosaic_0001>
module attributes {stable_mosaic.version = 11 : i64} {
  func.func @_phosc_loss_kernel(%arg0: i32, %arg1: i32, %arg2: memref<8x165xf32, #tpu.memory_space<vmem>>, %arg3: memref<8x604xf32, #tpu.memory_space<vmem>>, %arg4: memref<8x165xf32, #tpu.memory_space<vmem>>, %arg5: memref<8x604xf32, #tpu.memory_space<vmem>>, %arg6: memref<1x2xf32, #tpu.memory_space<smem>>, %arg7: memref<8x165xf32, #tpu.memory_space<vmem>>, %arg8: memref<8x604xf32, #tpu.memory_space<vmem>>) attributes {dimension_semantics = [#tpu.dimension_semantics<parallel>, #tpu.dimension_semantics<arbitrary>], iteration_bounds = array<i64: 1, 1>, scalar_prefetch = 0 : i64, scratch_operands = 2 : i64, tpu.core_type = #tpu.core_type<tc>, window_params = [{transform_indices = @transform_0, window_bounds = array<i64: 8, 165>}, {transform_indices = @transform_1, window_bounds = array<i64: 8, 604>}, {transform_indices = @transform_2, window_bounds = array<i64: 8, 165>}, {transform_indices = @transform_3, window_bounds = array<i64: 8, 604>}, {transform_indices = @transform_4, window_bounds = array<i64: 1, 2>}]} {
    %c0_i32 = arith.constant 0 : i32
    %0 = arith.cmpi eq, %arg1, %c0_i32 : i32
    %1 = arith.extui %0 : i1 to i32
    %c0_i32_0 = arith.constant 0 : i32
    %2 = arith.cmpi ne, %1, %c0_i32_0 : i32
    scf.if %2 {
      %cst_17 = arith.constant 0.000000e+00 : f32
      %37 = vector.broadcast %cst_17 : f32 to vector<8x165xf32>
      %c0_18 = arith.constant 0 : index
      %c0_19 = arith.constant 0 : index
      %38 = vector.load %arg7[%c0_18, %c0_19] : memref<8x165xf32, #tpu.memory_space<vmem>>, vector<8x165xf32>
      tpu.vector_store %arg7[%c0_18, %c0_19], %37 {strides = array<i32>} : memref<8x165xf32, #tpu.memory_space<vmem>>, vector<8x165xf32>,
      %cst_20 = arith.constant 0.000000e+00 : f32
      %39 = vector.broadcast %cst_20 : f32 to vector<8x604xf32>
      %c0_21 = arith.constant 0 : index
      %c0_22 = arith.constant 0 : index
      %40 = vector.load %arg8[%c0_21, %c0_22] : memref<8x604xf32, #tpu.memory_space<vmem>>, vector<8x604xf32>
      tpu.vector_store %arg8[%c0_21, %c0_22], %39 {strides = array<i32>} : memref<8x604xf32, #tpu.memory_space<vmem>>, vector<8x604xf32>,
    } else {
    }
    %c0 = arith.constant 0 : index
    %c0_1 = arith.constant 0 : index
    %3 = vector.load %arg2[%c0, %c0_1] : memref<8x165xf32, #tpu.memory_space<vmem>>, vector<8x165xf32>
    %c0_2 = arith.constant 0 : index
    %c0_3 = arith.constant 0 : index
    %4 = vector.load %arg3[%c0_2, %c0_3] : memref<8x604xf32, #tpu.memory_space<vmem>>, vector<8x604xf32>
    %c0_4 = arith.constant 0 : index
    %c0_5 = arith.constant 0 : index
    %5 = vector.load %arg4[%c0_4, %c0_5] : memref<8x165xf32, #tpu.memory_space<vmem>>, vector<8x165xf32>
    %c0_6 = arith.constant 0 : index
    %c0_7 = arith.constant 0 : index
    %6 = vector.load %arg5[%c0_6, %c0_7] : memref<8x604xf32, #tpu.memory_space<vmem>>, vector<8x604xf32>
    %7 = arith.subf %3, %5 : vector<8x165xf32>
    %8 = arith.mulf %7, %7 : vector<8x165xf32>
    %9 = math.log %4 : vector<8x604xf32>
    %cst = arith.constant -1.000000e+02 : f32
    %10 = vector.broadcast %cst : f32 to vector<8x604xf32>
    %11 = arith.maximumf %9, %10 : vector<8x604xf32>
    %cst_8 = arith.constant 1.000000e+00 : f32
    %12 = vector.broadcast %cst_8 : f32 to vector<8x604xf32>
    %13 = arith.subf %12, %4 : vector<8x604xf32>
    %14 = math.log %13 : vector<8x604xf32>
    %cst_9 = arith.constant -1.000000e+02 : f32
    %15 = vector.broadcast %cst_9 : f32 to vector<8x604xf32>
    %16 = arith.maximumf %14, %15 : vector<8x604xf32>
    %17 = arith.mulf %6, %11 : vector<8x604xf32>
    %cst_10 = arith.constant 1.000000e+00 : f32
    %18 = vector.broadcast %cst_10 : f32 to vector<8x604xf32>
    %19 = arith.subf %18, %6 : vector<8x604xf32>
    %20 = arith.mulf %19, %16 : vector<8x604xf32>
    %21 = arith.addf %17, %20 : vector<8x604xf32>
    %cst_11 = arith.constant 0.000000e+00 : f32
    %22 = vector.broadcast %cst_11 : f32 to vector<8x604xf32>
    %23 = arith.subf %22, %21 : vector<8x604xf32>
    %c1_i32 = arith.constant 1 : i32
    %24 = arith.muli %arg0, %c1_i32 : i32
    %25 = arith.addi %24, %arg1 : i32
    %c1_i32_12 = arith.constant 1 : i32
    %26 = arith.addi %25, %c1_i32_12 : i32
    %c8_i32 = arith.constant 8 : i32
    %27 = arith.muli %26, %c8_i32 : i32
    %c6_i32 = arith.constant 6 : i32
    %28 = arith.cmpi sgt, %27, %c6_i32 : i32
    %29 = arith.extui %28 : i1 to i32
    %c0_i32_13 = arith.constant 0 : i32
    %30 = arith.cmpi ne, %29, %c0_i32_13 : i32
    scf.if %30 {
      %c8_i32_17 = arith.constant 8 : i32
      %37 = arith.muli %25, %c8_i32_17 : i32
      %38 = tpu.iota {dimensions = array<i32: 0>} : vector<8x1xi32>
      %39 = vector.broadcast %37 : i32 to vector<8x1xi32>
      %40 = arith.addi %39, %38 : vector<8x1xi32>
      %c6_i32_18 = arith.constant 6 : i32
      %41 = vector.broadcast %c6_i32_18 : i32 to vector<8x1xi32>
      %42 = arith.cmpi slt, %40, %41 : vector<8x1xi32>
      %cst_19 = arith.constant 0.000000e+00 : f32
      %43 = vector.shape_cast %42 : vector<8x1xi1> to vector<8x1xi1>
      %44 = vector.broadcast %43 : vector<8x1xi1> to vector<8x165xi1>
      %45 = vector.broadcast %cst_19 : f32 to vector<8x165xf32>
      %46 = arith.select %44, %8, %45 : vector<8x165xi1>, vector<8x165xf32>
      %cst_20 = arith.constant 0.000000e+00 : f32
      %47 = vector.shape_cast %42 : vector<8x1xi1> to vector<8x1xi1>
      %48 = vector.broadcast %47 : vector<8x1xi1> to vector<8x604xi1>
      %49 = vector.broadcast %cst_20 : f32 to vector<8x604xf32>
      %50 = arith.select %48, %23, %49 : vector<8x604xi1>, vector<8x604xf32>
      %c0_21 = arith.constant 0 : index
      %c0_22 = arith.constant 0 : index
      %51 = vector.load %arg7[%c0_21, %c0_22] : memref<8x165xf32, #tpu.memory_space<vmem>>, vector<8x165xf32>
      %52 = arith.addf %51, %46 : vector<8x165xf32>
      %c0_23 = arith.constant 0 : index
      %c0_24 = arith.constant 0 : index
      %53 = vector.load %arg7[%c0_23, %c0_24] : memref<8x165xf32, #tpu.memory_space<vmem>>, vector<8x165xf32>
      tpu.vector_store %arg7[%c0_23, %c0_24], %52 {strides = array<i32>} : memref<8x165xf32, #tpu.memory_space<vmem>>, vector<8x165xf32>,
      %c0_25 = arith.constant 0 : index
      %c0_26 = arith.constant 0 : index
      %54 = vector.load %arg8[%c0_25, %c0_26] : memref<8x604xf32, #tpu.memory_space<vmem>>, vector<8x604xf32>
      %55 = arith.addf %54, %50 : vector<8x604xf32>
      %c0_27 = arith.constant 0 : index
      %c0_28 = arith.constant 0 : index
      %56 = vector.load %arg8[%c0_27, %c0_28] : memref<8x604xf32, #tpu.memory_space<vmem>>, vector<8x604xf32>
      tpu.vector_store %arg8[%c0_27, %c0_28], %55 {strides = array<i32>} : memref<8x604xf32, #tpu.memory_space<vmem>>, vector<8x604xf32>,
    } else {
    }
    %true = arith.constant true
    %31 = arith.xori %28, %true : i1
    %32 = arith.extui %31 : i1 to i32
    %c0_i32_14 = arith.constant 0 : i32
    %33 = arith.cmpi ne, %32, %c0_i32_14 : i32
    scf.if %33 {
      %c0_17 = arith.constant 0 : index
      %c0_18 = arith.constant 0 : index
      %37 = vector.load %arg7[%c0_17, %c0_18] : memref<8x165xf32, #tpu.memory_space<vmem>>, vector<8x165xf32>
      %38 = arith.addf %37, %8 : vector<8x165xf32>
      %c0_19 = arith.constant 0 : index
      %c0_20 = arith.constant 0 : index
      %39 = vector.load %arg7[%c0_19, %c0_20] : memref<8x165xf32, #tpu.memory_space<vmem>>, vector<8x165xf32>
      tpu.vector_store %arg7[%c0_19, %c0_20], %38 {strides = array<i32>} : memref<8x165xf32, #tpu.memory_space<vmem>>, vector<8x165xf32>,
      %c0_21 = arith.constant 0 : index
      %c0_22 = arith.constant 0 : index
      %40 = vector.load %arg8[%c0_21, %c0_22] : memref<8x604xf32, #tpu.memory_space<vmem>>, vector<8x604xf32>
      %41 = arith.addf %40, %23 : vector<8x604xf32>
      %c0_23 = arith.constant 0 : index
      %c0_24 = arith.constant 0 : index
      %42 = vector.load %arg8[%c0_23, %c0_24] : memref<8x604xf32, #tpu.memory_space<vmem>>, vector<8x604xf32>
      tpu.vector_store %arg8[%c0_23, %c0_24], %41 {strides = array<i32>} : memref<8x604xf32, #tpu.memory_space<vmem>>, vector<8x604xf32>,
    } else {
    }
    %c0_i32_15 = arith.constant 0 : i32
    %34 = arith.cmpi eq, %arg1, %c0_i32_15 : i32
    %35 = arith.extui %34 : i1 to i32
    %c0_i32_16 = arith.constant 0 : i32
    %36 = arith.cmpi ne, %35, %c0_i32_16 : i32
    scf.if %36 {
      %c0_17 = arith.constant 0 : index
      %c0_18 = arith.constant 0 : index
      %37 = vector.load %arg7[%c0_17, %c0_18] : memref<8x165xf32, #tpu.memory_space<vmem>>, vector<8x165xf32>
      %38 = vector.shape_cast %37 : vector<8x165xf32> to vector<1x8x165xf32>
      %cst_19 = arith.constant dense<0.000000e+00> : vector<1xf32>
      %39 = vector.multi_reduction <add>, %38, %cst_19 [1, 2] : vector<1x8x165xf32> to vector<1xf32>
      %40 = vector.shape_cast %39 : vector<1xf32> to vector<1x1x1xf32>
      %41 = vector.extract %40[0, 0, 0] : f32 from vector<1x1x1xf32>
      %c0_20 = arith.constant 0 : index
      %c0_21 = arith.constant 0 : index
      %42 = memref.load %arg6[%c0_20, %c0_21] : memref<1x2xf32, #tpu.memory_space<smem>>
      memref.store %41, %arg6[%c0_20, %c0_21] : memref<1x2xf32, #tpu.memory_space<smem>>
      %c0_22 = arith.constant 0 : index
      %c0_23 = arith.constant 0 : index
      %43 = vector.load %arg8[%c0_22, %c0_23] : memref<8x604xf32, #tpu.memory_space<vmem>>, vector<8x604xf32>
      %44 = vector.shape_cast %43 : vector<8x604xf32> to vector<1x8x604xf32>
      %cst_24 = arith.constant dense<0.000000e+00> : vector<1xf32>
      %45 = vector.multi_reduction <add>, %44, %cst_24 [1, 2] : vector<1x8x604xf32> to vector<1xf32>
      %46 = vector.shape_cast %45 : vector<1xf32> to vector<1x1x1xf32>
      %47 = vector.extract %46[0, 0, 0] : f32 from vector<1x1x1xf32>
      %c0_25 = arith.constant 0 : index
      %c1 = arith.constant 1 : index
      %48 = memref.load %arg6[%c0_25, %c1] : memref<1x2xf32, #tpu.memory_space<smem>>
      memref.store %47, %arg6[%c0_25, %c1] : memref<1x2xf32, #tpu.memory_space<smem>>
    } else {
    }
    return
  }
  func.func @transform_0(%arg0: i32, %arg1: i32) -> (i32, i32) {
    %c1_i32 = arith.constant 1 : i32
    %0 = arith.muli %arg0, %c1_i32 : i32
    %1 = arith.addi %0, %arg1 : i32
    %c0_i32 = arith.constant 0 : i32
    %c0_i32_0 = arith.constant 0 : i32
    return %1, %c0_i32 : i32, i32
  }
  func.func @transform_1(%arg0: i32, %arg1: i32) -> (i32, i32) {
    %c1_i32 = arith.constant 1 : i32
    %0 = arith.muli %arg0, %c1_i32 : i32
    %1 = arith.addi %0, %arg1 : i32
    %c0_i32 = arith.constant 0 : i32
    %c0_i32_0 = arith.constant 0 : i32
    return %1, %c0_i32 : i32, i32
  }
  func.func @transform_2(%arg0: i32, %arg1: i32) -> (i32, i32) {
    %c1_i32 = arith.constant 1 : i32
    %0 = arith.muli %arg0, %c1_i32 : i32
    %1 = arith.addi %0, %arg1 : i32
    %c0_i32 = arith.constant 0 : i32
    %c0_i32_0 = arith.constant 0 : i32
    return %1, %c0_i32 : i32, i32
  }
  func.func @transform_3(%arg0: i32, %arg1: i32) -> (i32, i32) {
    %c1_i32 = arith.constant 1 : i32
    %0 = arith.muli %arg0, %c1_i32 : i32
    %1 = arith.addi %0, %arg1 : i32
    %c0_i32 = arith.constant 0 : i32
    %c0_i32_0 = arith.constant 0 : i32
    return %1, %c0_i32 : i32, i32
  }
  func.func @transform_4(%arg0: i32, %arg1: i32) -> (i32, i32) {
    %c0_i32 = arith.constant 0 : i32
    %c0_i32_0 = arith.constant 0 : i32
    return %arg0, %c0_i32 : i32, i32
  }
}

</mosaic_0001>

<bundles_post_ra>
// kernel: tpu_custom_call.1
= control target key start
LH: loop header
LB: loop body
LE: loop exit
PB: predicated region body
PF: predicated region fallthrough
CT: control target
= control target key end

     0   :  { %9 = vsyncpa [#allocation5], 0  ;;  %s555_s0 = inlined_call_operand.hbm [shape: f32[6,165], index: 0, kind: input, shape index: {}]   ;;  %s556_s1 = inlined_call_operand.hbm [shape: f32[6,604], index: 1, kind: input, shape index: {}]   ;;  %s557_s2 = inlined_call_operand.hbm [shape: f32[6,165], index: 2, kind: input, shape index: {}]   ;;  %s558_s3 = inlined_call_operand.hbm [shape: f32[6,604], index: 3, kind: input, shape index: {}]   ;;  %s559_s4 = inlined_call_operand.hbm [shape: f32[1,2], index: 4, kind: output, shape index: {}]  }
   0x1   :  { %10 = vsyncpa [#allocation8], 0 }
   0x2   :  { %11 = vsyncpa [#allocation11], 0 }
   0x3   :  { %12 = vsyncpa [#allocation6], 0  ;;  %s441_s15 = smov [#allocation7]   ;;  %s442_s17 = smov [#allocation4]  }
   0x4   :  { %s37_s16 = sshll.u32 %s441_s15, 4  ;;  %s23_s18 = sshll.u32 %s442_s17, 4  ;;  %s38_s16 = int_to_ptr.vmem [resolvable:$true] %s37_s16  ;;  %s24_s18 = int_to_ptr.vmem [resolvable:$true] %s23_s18 }
   0x5   :  { %s335_s21 = scalar_lea.hbm %s556_s1, 640 }
   0x6   :  { %p336_p0 = scmp.ne.s32.totalorder %s556_s1, %s335_s21  ;;  %p339_p1 = scmp.lt.u32.totalorder %s335_s21, %s556_s1 }
   0x8   :  { %p341_p2 = pnand %p339_p1, %p336_p0 }
   0xa   :  { %344 = shalt.err (!%p341_p2)
}
   0xb   :  { %s345_s26 = scalar_lea.vmem %s38_s16, 640  ;;  %p350_p4 = scmp.lt.s32.totalorder %s38_s16, %s38_s16 }
   0xc   :  { %p346_p3 = scmp.ne.s32.totalorder %s38_s16, %s345_s26  ;;  %p351_p5 = scmp.lt.s32.totalorder %s345_s26, %s345_s26 }
   0xe   :  { %p352_p6 = por %p351_p5, %p350_p4 }
  0x10   :  { %p353_p7 = pnand %p352_p6, %p346_p3 }
  0x12   :  { %356 = shalt.err (!%p353_p7)
}
  0x13   :  { %40 = dma.hbm_to_vmem [thread:$0]  %s556_s1, 640, %s38_s16, [#allocation8]  }
  0x14   :  { %s357_s5 = scalar_lea.hbm %s555_s0, 256 }
  0x15   :  { %p358_p8 = scmp.ne.s32.totalorder %s555_s0, %s357_s5  ;;  %p361_p9 = scmp.lt.u32.totalorder %s357_s5, %s555_s0 }
  0x17   :  { %p363_p10 = pnand %p361_p9, %p358_p8 }
  0x19   :  { %366 = shalt.err (!%p363_p10)
}
  0x1a   :  { %s367_s10 = scalar_lea.vmem %s24_s18, 256  ;;  %p372_p12 = scmp.lt.s32.totalorder %s24_s18, %s24_s18 }
  0x1b   :  { %p368_p11 = scmp.ne.s32.totalorder %s24_s18, %s367_s10  ;;  %p373_p13 = scmp.lt.s32.totalorder %s367_s10, %s367_s10 }
  0x1d   :  { %p374_p0 = por %p373_p13, %p372_p12 }
  0x1f   :  { %p375_p1 = pnand %p374_p0, %p368_p11 }
  0x21   :  { %378 = shalt.err (!%p375_p1)
}
  0x22   :  { %26 = dma.hbm_to_vmem [thread:$0]  %s555_s0, 256, %s24_s18, [#allocation5]  }
  0x23   :  { %s443_s12 = smov [#allocation9]   ;;  %s444_s14 = smov [#allocation10]  }
  0x24   :  { %s51_s13 = sshll.u32 %s443_s12, 4  ;;  %s65_s15 = sshll.u32 %s444_s14, 4  ;;  %s52_s13 = int_to_ptr.vmem [resolvable:$true] %s51_s13  ;;  %s66_s15 = int_to_ptr.vmem [resolvable:$true] %s65_s15 }
  0x25   :  { %s379_s19 = scalar_lea.hbm %s557_s2, 256 }
  0x26   :  { %p380_p2 = scmp.ne.s32.totalorder %s557_s2, %s379_s19  ;;  %p383_p3 = scmp.lt.u32.totalorder %s379_s19, %s557_s2 }
  0x28   :  { %p385_p4 = pnand %p383_p3, %p380_p2 }
  0x2a   :  { %388 = shalt.err (!%p385_p4)
}
  0x2b   :  { %s389_s0 = scalar_lea.vmem %s52_s13, 256  ;;  %p394_p6 = scmp.lt.s32.totalorder %s52_s13, %s52_s13 }
  0x2c   :  { %p390_p5 = scmp.ne.s32.totalorder %s52_s13, %s389_s0  ;;  %p395_p7 = scmp.lt.s32.totalorder %s389_s0, %s389_s0 }
  0x2e   :  { %p396_p8 = por %p395_p7, %p394_p6 }
  0x30   :  { %p397_p9 = pnand %p396_p8, %p390_p5 }
  0x32   :  { %400 = shalt.err (!%p397_p9)
}
  0x33   :  { %54 = dma.hbm_to_vmem [thread:$0]  %s557_s2, 256, %s52_s13, [#allocation8]  }
  0x34   :  { %s401_s27 = scalar_lea.hbm %s558_s3, 640 }
  0x35   :  { %p402_p10 = scmp.ne.s32.totalorder %s558_s3, %s401_s27  ;;  %p405_p11 = scmp.lt.u32.totalorder %s401_s27, %s558_s3 }
  0x37   :  { %p407_p12 = pnand %p405_p11, %p402_p10 }
  0x39   :  { %410 = shalt.err (!%p407_p12)
}
  0x3a   :  { %s411_s6 = scalar_lea.vmem %s66_s15, 640  ;;  %p416_p0 = scmp.lt.s32.totalorder %s66_s15, %s66_s15 }
  0x3b   :  { %p412_p13 = scmp.ne.s32.totalorder %s66_s15, %s411_s6  ;;  %p417_p1 = scmp.lt.s32.totalorder %s411_s6, %s411_s6 }
  0x3d   :  { %p418_p2 = por %p417_p1, %p416_p0 }
  0x3f   :  { %p419_p3 = pnand %p418_p2, %p412_p13 }
  0x41   :  { %422 = shalt.err (!%p419_p3)
}
  0x42   :  { %68 = dma.hbm_to_vmem [thread:$0]  %s558_s3, 640, %s66_s15, [#allocation11]  }
  0x43   :  { %433 = dma.done.wait [#allocation5], 256  }
  0x44   :  { %434 = vsyncadd [#allocation5], 4294967040 }
  0x45   :  { %435 = dma.done.wait [#allocation8], 896  }
  0x46   :  { %436 = vsyncadd [#allocation8], 4294966400 }
  0x47   :  { %437 = dma.done.wait [#allocation11], 640  }
  0x48   :  { %438 = vsyncadd [#allocation11], 4294966656  ;;  %vm90_vm0 = vcmask 302080   ;;  %vm96_vm1 = vcmask 752640   ;;  %v445_v0 = vmov 0.0   ;;  %v184_v1 = vlaneseq  ;;  %v98_v2 = vld [vmem:[#allocation4] sm:$0xff] }
  0x49   :  { %91 = vst.msk [vmem:[#allocation2 + $0x8] sm:$0xff] %vm90_vm0, %v445_v0  ;;  %v99_v3 = vld [vmem:[#allocation4 + $0x8] sm:$0xff]  ;;  %v100_v4 = vld [vmem:[#allocation7] sm:$0xff]  ;;  %v101_v6 = vld [vmem:[#allocation7 + $0x8] sm:$0xff]  ;;  %s423_s1 = scalar_lea.hbm %s559_s4, 16 }
  0x4a   :  { %97 = vst.msk [vmem:[#allocation3 + $0x20] sm:$0xff] %vm96_vm1, %v445_v0  ;;  %v522_v5 = vshrl.u32 %v184_v1, 7  ;;  %v102_v7 = vld [vmem:[#allocation7 + $0x10] sm:$0xff]  ;;  %v103_v8 = vld [vmem:[#allocation7 + $0x18] sm:$0xff]  ;;  %315 = vlog2.f32 %v100_v4  ;;  %v131_v9 = vsub.f32 1.0, %v100_v4  ;;  %v105_v10 = vld [vmem:[#allocation9] sm:$0xff]  ;;  %p424_p4 = scmp.ne.s32.totalorder %s559_s4, %s423_s1  ;;  %p427_p5 = scmp.lt.u32.totalorder %s423_s1, %s559_s4 }
  0x4b   :  { %v106_v11 = vld [vmem:[#allocation9 + $0x8] sm:$0xff]  ;;  %317 = vlog2.f32 %v101_v6  ;;  %v132_v12 = vsub.f32 1.0, %v101_v6  ;;  %v112_v13 = vsub.f32 %v98_v2, %v105_v10  ;;  %v133_v15 = vsub.f32 1.0, %v102_v7  ;;  %v104_v17 = vld [vmem:[#allocation7 + $0x20] sm:$0xff]  ;;  %v107_v27 = vld [vmem:[#allocation10] sm:$0xff] }
  0x4c   :  { %v113_v14 = vsub.f32 %v99_v3, %v106_v11  ;;  %319 = vlog2.f32 %v102_v7  ;;  %v134_v16 = vsub.f32 1.0, %v103_v8  ;;  %vm188_vm2 = vcmp.lt.s32.totalorder %v522_v5, 6  ;;  %v108_v30 = vld [vmem:[#allocation10 + $0x8] sm:$0xff]  ;;  %v109_v31 = vld [vmem:[#allocation10 + $0x10] sm:$0xff]  ;;  %v110_v34 = vld [vmem:[#allocation10 + $0x18] sm:$0xff]  ;;  %p429_p6 = pnand %p427_p5, %p424_p4 }
  0x4d   :  { %321 = vlog2.f32 %v103_v8  ;;  %v114_v18 = vmul.f32 %v112_v13, %v112_v13  ;;  %v135_v21 = vsub.f32 1.0, %v104_v17  ;;  %v111_v37 = vld [vmem:[#allocation10 + $0x20] sm:$0xff]  ;;  %v156_v41 = vsub.f32 1.0, %v107_v27 }
  0x4e   :  { %v115_v19 = vmul.f32 %v113_v14, %v113_v14  ;;  %323 = vlog2.f32 %v131_v9  ;;  %v157_v45 = vsub.f32 1.0, %v108_v30  ;;  %v158_v46 = vsub.f32 1.0, %v109_v31 }
  0x4f   :  { %325 = vlog2.f32 %v132_v12  ;;  %v191_v22 = vsel %vm188_vm2, %v114_v18, 0.0  ;;  %v159_v50 = vsub.f32 1.0, %v110_v34  ;;  %v160_v52 = vsub.f32 1.0, %v111_v37 }
  0x50   :  { %v199_v20 = vld [vmem:[#allocation2 + $0x8] sm:$0xff]  ;;  %327 = vlog2.f32 %v133_v15  ;;  %v192_v23 = vsel %vm188_vm2, %v115_v19, 0.0 }
  0x51   :  { %329 = vlog2.f32 %v134_v16  ;;  %v201_v24 = vadd.f32 %v199_v20, %v192_v23 }
  0x52   :  { %331 = vlog2.f32 %v104_v17 }
  0x53   :  { %204 = vst.msk [vmem:[#allocation2 + $0x8] sm:$0xff] %vm90_vm0, %v201_v24  ;;  %333 = vlog2.f32 %v135_v21 }
  0x54   :  { %v316_v25 = vpop.eup %315 }
  0x55   :  { %v318_v26 = vpop.eup %317  ;;  %v117_v28 = vmul.f32 0.6931472, %v316_v25 }
  0x56   :  { %v320_v29 = vpop.eup %319  ;;  %v119_v32 = vmul.f32 0.6931472, %v318_v26 }
  0x57   :  { %v322_v33 = vpop.eup %321  ;;  %v121_v35 = vmul.f32 0.6931472, %v320_v29  ;;  %v126_v36 = vmax.f32 %v117_v28, -100.0  ;;  %v209_v29 = vld [vmem:[#allocation3 + $0x20] sm:$0xff] }
  0x58   :  { %v324_v38 = vpop.eup %323  ;;  %v123_v39 = vmul.f32 0.6931472, %v322_v33  ;;  %v127_v40 = vmax.f32 %v119_v32, -100.0 }
  0x59   :  { %v326_v42 = vpop.eup %325  ;;  %v128_v43 = vmax.f32 %v121_v35, -100.0  ;;  %v137_v44 = vmul.f32 0.6931472, %v324_v38  ;;  %v151_v56 = vmul.f32 %v126_v36, %v107_v27 }
  0x5a   :  { %v328_v47 = vpop.eup %327  ;;  %v129_v48 = vmax.f32 %v123_v39, -100.0  ;;  %v139_v49 = vmul.f32 0.6931472, %v326_v42  ;;  %v252_v51 = vld [vmem:[#allocation2 + $0x8] sm:$0xff]  ;;  %v152_v61 = vmul.f32 %v127_v40, %v108_v30 }
  0x5b   :  { %v330_v53 = vpop.eup %329  ;;  %v141_v54 = vmul.f32 0.6931472, %v328_v47  ;;  %v146_v55 = vmax.f32 %v137_v44, -100.0  ;;  %v254_v57 = vsel %vm90_vm0, %v252_v51, 0.0  ;;  %v153_v1 = vmul.f32 %v128_v43, %v109_v31 }
  0x5c   :  { %v332_v58 = vpop.eup %331  ;;  %v143_v59 = vmul.f32 0.6931472, %v330_v53  ;;  %v147_v60 = vmax.f32 %v139_v49, -100.0  ;;  %v255_v62 = vadd.f32 %v254_v57, %v191_v22  ;;  %v154_v6 = vmul.f32 %v129_v48, %v110_v34 }
  0x5d   :  { %v334_v63 = vpop.eup %333  ;;  %v148_v0 = vmax.f32 %v141_v54, -100.0  ;;  %v161_v2 = vmul.f32 %v156_v41, %v146_v55  ;;  %v125_v3 = vmul.f32 0.6931472, %v332_v58 }
  0x5e   :  { %v149_v4 = vmax.f32 %v143_v59, -100.0  ;;  %v162_v7 = vmul.f32 %v157_v45, %v147_v60  ;;  %256 = vadd.xlane.f32.xlu0 %v255_v62  ;;  %v145_v8 = vmul.f32 0.6931472, %v334_v63 }
  0x5f   :  { %v163_v9 = vmul.f32 %v158_v46, %v148_v0  ;;  %v166_v10 = vadd.f32 %v161_v2, %v151_v56  ;;  %v130_v11 = vmax.f32 %v125_v3, -100.0 }
  0x60   :  { %v164_v12 = vmul.f32 %v159_v50, %v149_v4  ;;  %v167_v13 = vadd.f32 %v162_v7, %v152_v61  ;;  %v150_v14 = vmax.f32 %v145_v8, -100.0 }
  0x61   :  { %v168_v15 = vadd.f32 %v163_v9, %v153_v1  ;;  %v171_v16 = vsub.f32 0.0, %v166_v10  ;;  %v155_v17 = vmul.f32 %v130_v11, %v111_v37 }
  0x62   :  { %v169_v18 = vadd.f32 %v164_v12, %v154_v6  ;;  %v172_v19 = vsub.f32 0.0, %v167_v13  ;;  %v165_v20 = vmul.f32 %v160_v52, %v150_v14 }
  0x63   :  { %v173_v21 = vsub.f32 0.0, %v168_v15  ;;  %v193_v22 = vsel %vm188_vm2, %v171_v16, 0.0 }
  0x64   :  { %v174_v23 = vsub.f32 0.0, %v169_v18  ;;  %v194_v24 = vsel %vm188_vm2, %v172_v19, 0.0  ;;  %v170_v25 = vadd.f32 %v165_v20, %v155_v17 }
  0x65   :  { %v195_v26 = vsel %vm188_vm2, %v173_v21, 0.0  ;;  %v272_v31 = vadd.f32 %v194_v24, %v193_v22 }
  0x66   :  { %v196_v27 = vsel %vm188_vm2, %v174_v23, 0.0  ;;  %v175_v28 = vsub.f32 0.0, %v170_v25 }
  0x67   :  { %v273_v33 = vadd.f32 %v272_v31, %v195_v26 }
  0x68   :  { %v197_v30 = vsel %vm188_vm2, %v175_v28, 0.0 }
  0x69   :  { %v214_v32 = vadd.f32 %v209_v29, %v197_v30  ;;  %v274_v34 = vadd.f32 %v273_v33, %v196_v27 }
  0x6b   :  { %220 = vst.msk [vmem:[#allocation3 + $0x20] sm:$0xff] %vm96_vm1, %v214_v32 }
  0x72   :  { %v271_v35 = vld [vmem:[#allocation3 + $0x20] sm:$0xff] }
  0x73   :  { %v276_v36 = vsel %vm96_vm1, %v271_v35, 0.0 }
  0x74   :  { %v277_v37 = vadd.f32 %v276_v36, %v274_v34 }
  0x76   :  { %278 = vadd.xlane.f32.xlu0 %v277_v37 }
  0xeb   :  { %v257_v38 = vpop.xlane.xlu0 %256 }
  0xec   :  { %v258_v39 = vrot.slane %v257_v38, 4 }
  0xee   :  { %v259_v40 = vadd.f32 %v258_v39, %v257_v38 }
  0xf0   :  { %v260_v41 = vrot.slane %v259_v40, 2 }
  0xf2   :  { %v261_v42 = vadd.f32 %v260_v41, %v259_v40 }
  0xf4   :  { %v262_v43 = vrot.slane %v261_v42, 1 }
  0xf6   :  { %v263_v44 = vadd.f32 %v262_v43, %v261_v42 }
  0xf8   :  { %305 = vpush %v263_v44 }
 0x103   :  { %v279_v5 = vpop.xlane.xlu0 %278 }
 0x104   :  { %v280_v45 = vrot.slane %v279_v5, 4 }
 0x106   :  { %v281_v46 = vadd.f32 %v280_v45, %v279_v5 }
 0x108   :  { %v282_v47 = vrot.slane %v281_v46, 2 }
 0x10a   :  { %v283_v48 = vadd.f32 %v282_v47, %v281_v46 }
 0x10c   :  { %v284_v49 = vrot.slane %v283_v48, 1 }
 0x10e   :  { %v285_v50 = vadd.f32 %v284_v49, %v283_v48 }
 0x110   :  { %307 = vpush %v285_v50 }
 0x129   :  { %s306_s3 = spop %305 }
 0x12a   :  { %266 = sst [smem:[#allocation12]] %s306_s3 }
 0x141   :  { %s308_s8 = spop %307 }
 0x142   :  { %288 = sst [smem:[#allocation12 + $0x1]] %s308_s8 }
 0x143   :  { %432 = shalt.err (!%p429_p6)
}
 0x144   :  { %s446_s15 = smov [#allocation12]  }
 0x145   :  { %296 = dma.smem_to_hbm %s446_s15, 16, %s559_s4, [#allocation6]  }
 0x146   :  { %439 = dma.done.wait [#allocation6], 16  }
 0x147   :  { %440 = vsyncadd [#allocation6], 4294967280 }
 0x148   :  { %300 = sfence }
 0x149   :  { %301 = vsyncpa [#allocation5], 1 }
 0x14a   :  { %302 = vsyncpa [#allocation8], 1 }
 0x14b   :  { %303 = vsyncpa [#allocation11], 1 }
 0x14c   :  { %304 = vsyncpa [#allocation6], 1 }

</bundles_post_ra>
